<compile_context>
chip_gen: v6e
topology: v6e:2x2x1
jax: 0.10.0
libtpu: 0.0.40
codegen_flags: <defaults>
</compile_context>

<pallas_src>
import functools
import math

import jax
import jax.numpy as jnp
from jax.experimental import pallas as pl
from jax.experimental.pallas import tpu as pltpu


# ----------------------------- small helpers ---------------------------------
def _round_up(x, m):
    return ((x + m - 1) // m) * m


def _pad_lane(x):                         # pad a channel-like dim to lane width
    return max(128, _round_up(x, 128))


def _choose_tile_m(m):                    # row tile: 256 big / 128 medium / tiny
    if m >= 1024:
        return 256
    if m >= 128:
        return 128
    return _round_up(m, 16)


# ----------------------------- GEMM kernel ------------------------------------
# Fused:  [optional A-side prologue: relu(a*pre_s + pre_b)  (= BN+ReLU before a
#          1x1 conv)]  ->  bf16 MXU matmul (f32 acc)  ->  epilogue
#          acc*post_s + post_b (folded BN or bias)  ->  {none|relu|sigmoid*15}.
def _gemm_kernel(*refs, has_prologue, activation):
    if has_prologue:
        a_ref, b_ref, ps_ref, pb_ref, qs_ref, qb_ref, o_ref = refs
        a = jnp.maximum(a_ref[...] * ps_ref[...] + pb_ref[...], 0.0)   # bf16 VPU
        a = a.astype(jnp.bfloat16)
    else:
        a_ref, b_ref, qs_ref, qb_ref, o_ref = refs
        a = a_ref[...]
    acc = jnp.dot(a, b_ref[...], preferred_element_type=jnp.float32)   # bf16 MXU
    acc = acc * qs_ref[...] + qb_ref[...]                              # f32 epilogue
    if activation == "relu":
        acc = jnp.maximum(acc, 0.0)
    elif activation == "sigmoid15":
        acc = jax.nn.sigmoid(acc) * 15.0
    o_ref[...] = acc.astype(o_ref.dtype)


@functools.partial(jax.jit,
                   static_argnames=("has_prologue", "activation", "tile_m",
                                    "out_dtype"))
def _gemm_call(a_pad, b_pad, pre_s, pre_b, post_s, post_b, *,
               has_prologue, activation, tile_m, out_dtype):
    m_pad, k_pad = a_pad.shape
    _, n_pad = b_pad.shape
    kern = functools.partial(_gemm_kernel, has_prologue=has_prologue,
                             activation=activation)
    in_specs = [pl.BlockSpec((tile_m, k_pad), lambda i: (i, 0)),
                pl.BlockSpec((k_pad, n_pad), lambda i: (0, 0))]
    operands = [a_pad, b_pad]
    if has_prologue:
        in_specs += [pl.BlockSpec((1, k_pad), lambda i: (0, 0)),
                     pl.BlockSpec((1, k_pad), lambda i: (0, 0))]
        operands += [pre_s, pre_b]
    in_specs += [pl.BlockSpec((1, n_pad), lambda i: (0, 0)),
                 pl.BlockSpec((1, n_pad), lambda i: (0, 0))]
    operands += [post_s, post_b]
    return pl.pallas_call(
        kern,
        out_shape=jax.ShapeDtypeStruct((m_pad, n_pad), out_dtype),
        grid=(m_pad // tile_m,),
        in_specs=in_specs,
        out_specs=pl.BlockSpec((tile_m, n_pad), lambda i: (i, 0)),
        compiler_params=pltpu.CompilerParams(dimension_semantics=("parallel",)),
    )(*operands)


def gemm(a, wp, out_dtype=jnp.bfloat16):
    """a:(M,K) activation (bf16) x prepared weight entry wp -> (M, wp['n'])."""
    M, K = a.shape
    k_pad, n_pad = wp["b"].shape
    assert K == wp["k"], (K, wp["k"])
    tile_m = _choose_tile_m(M)
    m_pad = _round_up(M, tile_m)
    a_pad = jnp.pad(a.astype(jnp.bfloat16), ((0, m_pad - M), (0, k_pad - K)))
    out = _gemm_call(a_pad, wp["b"], wp.get("pre_s"), wp.get("pre_b"),
                     wp["post_s"], wp["post_b"],
                     has_prologue=("pre_s" in wp), activation=wp["act"],
                     tile_m=tile_m, out_dtype=out_dtype)
    return out[:M, :wp["n"]]


# ----------------------------- pooling kernels --------------------------------
def _pool_max_kernel(*refs):
    *ins, o_ref = refs
    acc = ins[0][...]
    for r in ins[1:]:
        acc = jnp.maximum(acc, r[...])
    o_ref[...] = acc


def _pool_mean_kernel(*refs, inv):
    *ins, o_ref = refs
    acc = ins[0][...].astype(jnp.float32)
    for r in ins[1:]:
        acc = acc + r[...].astype(jnp.float32)
    o_ref[...] = (acc * inv).astype(o_ref.dtype)


@functools.partial(jax.jit, static_argnames=("op", "tile"))
def _pool_call(slices, *, op, tile):
    m_pad, c_pad = slices[0].shape
    k2 = len(slices)
    if op == "max":
        kern = _pool_max_kernel
    else:
        kern = functools.partial(_pool_mean_kernel, inv=1.0 / k2)
    return pl.pallas_call(
        kern,
        out_shape=jax.ShapeDtypeStruct((m_pad, c_pad), slices[0].dtype),
        grid=(m_pad // tile,),
        in_specs=[pl.BlockSpec((tile, c_pad), lambda i: (i, 0))
                  for _ in range(k2)],
        out_specs=pl.BlockSpec((tile, c_pad), lambda i: (i, 0)),
        compiler_params=pltpu.CompilerParams(dimension_semantics=("parallel",)),
    )(*slices)


def pool2d(x_nhwc, k, stride, pad, op):
    """max / mean pooling: k*k shifted windows as separate gridded operands."""
    N, H, W, C = x_nhwc.shape
    oh = (H + 2 * pad - k) // stride + 1
    ow = (W + 2 * pad - k) // stride + 1
    M = N * oh * ow
    c_pad = _pad_lane(C)
    pad_val = float("-inf") if op == "max" else 0.0
    xp = jnp.pad(x_nhwc, ((0, 0), (pad, pad), (pad, pad), (0, c_pad - C)),
                 constant_values=pad_val)
    tile = _choose_tile_m(M)
    m_pad = _round_up(M, tile)
    slices = []
    for i in range(k):
        for j in range(k):
            s = xp[:, i:i + (oh - 1) * stride + 1:stride,
                      j:j + (ow - 1) * stride + 1:stride, :].reshape(M, c_pad)
            if m_pad > M:
                s = jnp.pad(s, ((0, m_pad - M), (0, 0)),
                            constant_values=pad_val)
            slices.append(s)
    out = _pool_call(tuple(slices), op=op, tile=tile)
    return out[:M, :C].reshape(N, oh, ow, C)


# Global average pool fused with norm5 + ReLU (relu(x*s+b) averaged over H*W).
def _gap_kernel(x_ref, s_ref, b_ref, o_ref, *, inv_hw):
    x = x_ref[...].astype(jnp.float32)            # (N, HW, C)
    s = s_ref[...].reshape(1, 1, -1)
    b = b_ref[...].reshape(1, 1, -1)
    x = jnp.maximum(x * s + b, 0.0)
    o_ref[...] = (jnp.sum(x, axis=1) * inv_hw).astype(o_ref.dtype)


@jax.jit
def _gap_call(x3, scale, shift):
    N, HW, C = x3.shape
    return pl.pallas_call(
        functools.partial(_gap_kernel, inv_hw=1.0 / HW),
        out_shape=jax.ShapeDtypeStruct((N, C), jnp.bfloat16),
    )(x3, scale, shift)


def global_avg_pool_bn_relu(x_nhwc, scale, shift):
    N, H, W, C = x_nhwc.shape
    return _gap_call(x_nhwc.reshape(N, H * W, C), scale, shift)


# ----------------------------- JAX glue: im2col / conv ------------------------
def _im2col(x, kh, kw, stride, pad):
    """NHWC -> (N*OH*OW, kh*kw*C) patch matrix, ordering (kh, kw, c)."""
    N, H, W, C = x.shape
    xp = jnp.pad(x, ((0, 0), (pad, pad), (pad, pad), (0, 0)))
    oh = (H + 2 * pad - kh) // stride + 1
    ow = (W + 2 * pad - kw) // stride + 1
    cols = []
    for i in range(kh):
        for j in range(kw):
            cols.append(xp[:, i:i + (oh - 1) * stride + 1:stride,
                            j:j + (ow - 1) * stride + 1:stride, :])
    a = jnp.concatenate(cols, axis=-1).reshape(N * oh * ow, kh * kw * C)
    return a, (N, oh, ow)


def conv2d(x_nhwc, wp, stride, pad):
    a, (N, oh, ow) = _im2col(x_nhwc, wp["kh"], wp["kw"], stride, pad)
    out = gemm(a, wp)
    return out.reshape(N, oh, ow, wp["n"])


# ----------------------------- DenseNet-121 ----------------------------------
GROWTH, BN_SIZE, INIT_FEAT = 32, 4, 64
BLOCK_CONFIG = (6, 12, 24, 16)               # DenseNet-121


def init_params(key):
    """Synthetic DenseNet-121 params, pre-transposed / pre-padded / bf16-cast."""
    cnt = [0]

    def nk():
        cnt[0] += 1
        return jax.random.fold_in(key, cnt[0])

    def conv_w(o, i, kh, kw):                # kaiming-normal fan_in (torchvision)
        std = math.sqrt(2.0 / (i * kh * kw))
        return jax.random.normal(nk(), (o, i, kh, kw), jnp.float32) * std

    def bn(c):                               # folded inference BN, torch defaults
        eps = 1e-5                           # gamma=1, beta=0, mean=0, var=1
        scale = jnp.full((c,), 1.0 / math.sqrt(1.0 + eps), jnp.float32)
        shift = jnp.zeros((c,), jnp.float32)
        return scale, shift

    def prep_conv(w_oihw, pre=None, post=None, act="none"):
        O, I, KH, KW = w_oihw.shape
        K = KH * KW * I
        k_pad, n_pad = _pad_lane(K), _pad_lane(O)
        b = jnp.transpose(w_oihw, (2, 3, 1, 0)).reshape(K, O)       # (kh,kw,c)->O
        b = jnp.pad(b, ((0, k_pad - K), (0, n_pad - O))).astype(jnp.bfloat16)
        e = {"b": b, "k": K, "n": O, "kh": KH, "kw": KW, "act": act}
        if pre is not None:                  # BN+ReLU fused on the A side (1x1)
            s, t = pre
            e["pre_s"] = jnp.pad(s, (0, k_pad - K)).reshape(1, k_pad).astype(jnp.bfloat16)
            e["pre_b"] = jnp.pad(t, (0, k_pad - K)).reshape(1, k_pad).astype(jnp.bfloat16)
        ps, pb = post if post is not None else (
            jnp.ones((O,), jnp.float32), jnp.zeros((O,), jnp.float32))
        e["post_s"] = jnp.pad(ps, (0, n_pad - O)).reshape(1, n_pad)
        e["post_b"] = jnp.pad(pb, (0, n_pad - O)).reshape(1, n_pad)
        return e

    def prep_linear(o, i, std, act):
        w = jax.random.normal(nk(), (o, i), jnp.float32) * std
        bias = jnp.zeros((o,), jnp.float32)
        k_pad, n_pad = _pad_lane(i), _pad_lane(o)
        b = jnp.pad(w.T, ((0, k_pad - i), (0, n_pad - o))).astype(jnp.bfloat16)
        return {"b": b, "k": i, "n": o, "kh": 1, "kw": 1, "act": act,
                "post_s": jnp.pad(jnp.ones((o,), jnp.float32),
                                  (0, n_pad - o)).reshape(1, n_pad),
                "post_b": jnp.pad(bias, (0, n_pad - o)).reshape(1, n_pad)}

    params = {}
    # stem: conv0 7x7/s2 -> norm0+relu fused as the GEMM epilogue
    params["conv0"] = prep_conv(conv_w(INIT_FEAT, 3, 7, 7),
                                pre=None, post=bn(INIT_FEAT), act="relu")
    blocks, transitions = [], []
    c = INIT_FEAT
    for bi, n_layers in enumerate(BLOCK_CONFIG):
        layers = []
        for _ in range(n_layers):
            layers.append({
                # conv1: prologue = norm1+relu, epilogue = norm2+relu
                "conv1": prep_conv(conv_w(BN_SIZE * GROWTH, c, 1, 1),
                                   pre=bn(c), post=bn(BN_SIZE * GROWTH),
                                   act="relu"),
                # conv2: plain 3x3 conv (input already activated by conv1 epi)
                "conv2": prep_conv(conv_w(GROWTH, BN_SIZE * GROWTH, 3, 3)),
            })
            c += GROWTH
        blocks.append(layers)
        if bi < len(BLOCK_CONFIG) - 1:
            transitions.append(
                {"conv": prep_conv(conv_w(c // 2, c, 1, 1), pre=bn(c))})
            c //= 2
    params["blocks"] = blocks
    params["transitions"] = transitions
    s5, b5 = bn(c)                                            # c == 1024
    params["norm5"] = (s5.reshape(1, c), b5.reshape(1, c))    # fused into GAP
    params["classifier"] = prep_linear(512, c, 1.0 / math.sqrt(c), act="relu")
    params["fc1"] = prep_linear(128, 512, math.sqrt(2.0 / 128), act="relu")
    params["fc2"] = prep_linear(1, 128, math.sqrt(2.0 / (128 + 1)),
                                act="sigmoid15")
    return params


def dense_layer(x, p):
    N, H, W, C = x.shape
    h = gemm(x.reshape(-1, C), p["conv1"])              # norm1+relu -> 1x1 -> norm2+relu
    h = h.reshape(N, H, W, p["conv1"]["n"])
    h = conv2d(h, p["conv2"], stride=1, pad=1)          # 3x3 conv, growth=32
    return jnp.concatenate([x, h], axis=-1)


def transition(x, p):
    N, H, W, C = x.shape
    h = gemm(x.reshape(-1, C), p["conv"])               # norm+relu -> 1x1 conv
    h = h.reshape(N, H, W, p["conv"]["n"])
    return pool2d(h, k=2, stride=2, pad=0, op="mean")   # AvgPool2d(2,2)


def forward(params, spectrogram_nchw):
    """Forward pass of CustomDenseNetTBDrms. Input: NCHW float spectrogram."""
    x = jnp.transpose(spectrogram_nchw, (0, 2, 3, 1)).astype(jnp.bfloat16)  # NHWC
    # --- DenseNet-121 features ---
    x = conv2d(x, params["conv0"], stride=2, pad=3)     # conv0 + norm0 + relu
    x = pool2d(x, k=3, stride=2, pad=1, op="max")       # MaxPool2d(3,2,1)
    for bi, block in enumerate(params["blocks"]):
        for lp in block:
            x = dense_layer(x, lp)
        if bi < len(params["blocks"]) - 1:
            x = transition(x, params["transitions"][bi])
    x = global_avg_pool_bn_relu(x, *params["norm5"])    # norm5+relu+avgpool -> (N,1024)
    # --- classifier + head (bias / relu / sigmoid*15 fused into the GEMMs) ---
    x = gemm(x, params["classifier"])                   # densenet classifier, relu
    x = gemm(x, params["fc1"])                          # fc1, relu
    x = gemm(x, params["fc2"], out_dtype=jnp.float32)   # fc2, sigmoid * 15
    return x                                            # (N, 1)


if __name__ == "__main__":
    params = init_params(jax.random.PRNGKey(42))
    # smallest spatial size that survives DenseNet's 32x downsampling
    x = jax.random.normal(jax.random.PRNGKey(0), (2, 3, 32, 32), jnp.float32)  # NCHW
    out = jax.block_until_ready(forward(params, x))
    assert out.shape == (2, 1), out.shape
    assert bool(jnp.all(jnp.isfinite(out)))
    assert bool(jnp.all((out >= 0.0) & (out <= 15.0)))
    print("KERNEL_OK")
</pallas_src>

<mosaic_0001>
module attributes {stable_mosaic.version = 11 : i64} {
  func.func @_gemm_kernel(%arg0: i32, %arg1: memref<128x256xbf16, #tpu.memory_space<vmem>>, %arg2: memref<256x128xbf16, #tpu.memory_space<vmem>>, %arg3: memref<1x128xf32, #tpu.memory_space<vmem>>, %arg4: memref<1x128xf32, #tpu.memory_space<vmem>>, %arg5: memref<128x128xbf16, #tpu.memory_space<vmem>>) attributes {dimension_semantics = [#tpu.dimension_semantics<parallel>], iteration_bounds = array<i64: 4>, scalar_prefetch = 0 : i64, scratch_operands = 0 : i64, tpu.core_type = #tpu.core_type<tc>, window_params = [{transform_indices = @transform_0, window_bounds = array<i64: 128, 256>}, {pipeline_mode = #tpu.pipeline_mode<synchronous>, transform_indices = @transform_1, window_bounds = array<i64: 256, 128>}, {pipeline_mode = #tpu.pipeline_mode<synchronous>, transform_indices = @transform_2, window_bounds = array<i64: 1, 128>}, {pipeline_mode = #tpu.pipeline_mode<synchronous>, transform_indices = @transform_3, window_bounds = array<i64: 1, 128>}, {transform_indices = @transform_4, window_bounds = array<i64: 128, 128>}]} {
    %c0 = arith.constant 0 : index
    %c0_0 = arith.constant 0 : index
    %0 = vector.load %arg1[%c0, %c0_0] : memref<128x256xbf16, #tpu.memory_space<vmem>>, vector<128x256xbf16>
    %c0_1 = arith.constant 0 : index
    %c0_2 = arith.constant 0 : index
    %1 = vector.load %arg2[%c0_1, %c0_2] : memref<256x128xbf16, #tpu.memory_space<vmem>>, vector<256x128xbf16>
    %cst = arith.constant dense<0.000000e+00> : vector<128x128xf32>
    %2 = tpu.matmul %0, %1, %cst {dimension_numbers = #tpu.dot_dimension_numbers<[1], [0], [0], [1], [0, 0, 1, 1], [], []>} : vector<128x256xbf16>, vector<256x128xbf16>, vector<128x128xf32> -> vector<128x128xf32>
    %c0_3 = arith.constant 0 : index
    %c0_4 = arith.constant 0 : index
    %3 = vector.load %arg3[%c0_3, %c0_4] : memref<1x128xf32, #tpu.memory_space<vmem>>, vector<1x128xf32>
    %4 = vector.broadcast %3 : vector<1x128xf32> to vector<128x128xf32>
    %5 = arith.mulf %2, %4 : vector<128x128xf32>
    %c0_5 = arith.constant 0 : index
    %c0_6 = arith.constant 0 : index
    %6 = vector.load %arg4[%c0_5, %c0_6] : memref<1x128xf32, #tpu.memory_space<vmem>>, vector<1x128xf32>
    %7 = vector.broadcast %6 : vector<1x128xf32> to vector<128x128xf32>
    %8 = arith.addf %5, %7 : vector<128x128xf32>
    %cst_7 = arith.constant 0.000000e+00 : f32
    %9 = vector.broadcast %cst_7 : f32 to vector<128x128xf32>
    %10 = arith.maximumf %8, %9 : vector<128x128xf32>
    %11 = arith.truncf %10 : vector<128x128xf32> to vector<128x128xbf16>
    %c0_8 = arith.constant 0 : index
    %c0_9 = arith.constant 0 : index
    %12 = vector.load %arg5[%c0_8, %c0_9] : memref<128x128xbf16, #tpu.memory_space<vmem>>, vector<128x128xbf16>
    tpu.vector_store %arg5[%c0_8, %c0_9], %11 {strides = array<i32>} : memref<128x128xbf16, #tpu.memory_space<vmem>>, vector<128x128xbf16>,
    return
  }
  func.func @transform_0(%arg0: i32) -> (i32, i32) {
    %c0_i32 = arith.constant 0 : i32
    %c0_i32_0 = arith.constant 0 : i32
    return %arg0, %c0_i32 : i32, i32
  }
  func.func @transform_1(%arg0: i32) -> (i32, i32) {
    %c0_i32 = arith.constant 0 : i32
    %c0_i32_0 = arith.constant 0 : i32
    %c0_i32_1 = arith.constant 0 : i32
    return %c0_i32, %c0_i32_0 : i32, i32
  }
  func.func @transform_2(%arg0: i32) -> (i32, i32) {
    %c0_i32 = arith.constant 0 : i32
    %c0_i32_0 = arith.constant 0 : i32
    %c0_i32_1 = arith.constant 0 : i32
    return %c0_i32, %c0_i32_0 : i32, i32
  }
  func.func @transform_3(%arg0: i32) -> (i32, i32) {
    %c0_i32 = arith.constant 0 : i32
    %c0_i32_0 = arith.constant 0 : i32
    %c0_i32_1 = arith.constant 0 : i32
    return %c0_i32, %c0_i32_0 : i32, i32
  }
  func.func @transform_4(%arg0: i32) -> (i32, i32) {
    %c0_i32 = arith.constant 0 : i32
    %c0_i32_0 = arith.constant 0 : i32
    return %arg0, %c0_i32 : i32, i32
  }
}

</mosaic_0001>

<bundles_post_ra>
// kernel: _gemm_call.1
= control target key start
LH: loop header
LB: loop body
LE: loop exit
PB: predicated region body
PF: predicated region fallthrough
CT: control target
= control target key end

     0   :  { %9 = vsyncpa [#allocation3], 0  ;;  %s1516_s0 = inlined_call_operand.hbm [shape: bf16[512,256], index: 0, kind: input, shape index: {}]   ;;  %s1517_s1 = inlined_call_operand.hbm [shape: bf16[256,128], index: 1, kind: input, shape index: {}]   ;;  %s1518_s2 = inlined_call_operand.vmem [shape: f32[1,128], index: 2, kind: input, shape index: {}]   ;;  %s1519_s3 = inlined_call_operand.vmem [shape: f32[1,128], index: 3, kind: input, shape index: {}]   ;;  %s1520_s4 = inlined_call_operand.hbm [shape: bf16[512,128], index: 4, kind: output, shape index: {}]  }
   0x1   :  { %11 = vsyncpa [#allocation3 + $0x1], 0 }
   0x2   :  { %12 = vsyncpa [#allocation6], 0 }
   0x3   :  { %13 = vsyncpa [#allocation4], 0 }
   0x4   :  { %15 = vsyncpa [#allocation4 + $0x1], 0  ;;  %s1269_s15 = smov 0   ;;  %s1271_s16 = smov 0  }
   0x5   :  { %s1273_s17 = smov 0   ;;  %s1275_s18 = smov 0  }
   0x6 LB: > { %s1290_s19 = sadd.s32 4294967295, %s1233_s18   ;;  %s795_s20 = sadd.s32 4294967294, %s1233_s18   ;;  %s1233_s18 = sphi %s1275_s18, %s1541_s18   ;;  %s1229_s17 = sphi %s1273_s17, %s1540_s17   ;;  %s1225_s16 = sphi %s1271_s16, %s1539_s16   ;;  %s1221_s15 = sphi %s1269_s15, %s1538_s15  }
   0x7   : > { %p41_p0 = scmp.ne.s32.totalorder %s1225_s16, %s1221_s15  ;;  %p1521_p1 = scmp.eq.s32.totalorder %s1290_s19, 0 }
   0x8   : > { %p134_p3 = scmp.eq.s32.totalorder %s795_s20, 3  ;;  %p796_p5 = scmp.ge.s32.totalorder %s1233_s18, 1 }
   0x9   : > { %p1299_p4 = por %p1521_p1, %p41_p0  ;;  %p141_p7 = scmp.lt.s32.totalorder %s1233_s18, 5 }
   0xa   : > { %p1304_p6 = por %p134_p3, %p41_p0  ;;  %s1235_s24 = smov [#allocation5]  }
   0xb   : > { %s1525_s21 = scalar_select %p1299_p4, 1, 0 }
   0xc   : > { %s1526_s22 = scalar_select %p1304_p6, 1, 0 }
   0xd   : > { %p1309_p8 = pnand %p796_p5, %p141_p7  ;;  %s153_s25 = sshll.u32 %s1235_s24, 4  ;;  %s154_s25 = int_to_ptr.vmem [resolvable:$true] %s153_s25 }
   0xe   : > { %s1322_s27 = sadd.s32 1, %s1233_s18   ;;  %s28_s28 = sadd.s32 1, %s1229_s17 }
   0xf   : > { %s1527_s23 = scalar_select %p1309_p8, 1, 0 }
  0x10   : > { %p1016_p9 = pneg %p1309_p8  ;;  %s25_s29 = ssub.s32 %s1233_s18, %s1322_s27 }
  0x11   : > { %s1122_s30 = scalar_lea.vmem %s154_s25, 2048  ;;  %p1130_p3 = scmp.lt.s32.totalorder %s154_s25, %s154_s25 }
  0x12   : > { %p1317_p10 = pnand %p1016_p9, %p1521_p1  ;;  %p1123_p12 = scmp.ne.s32.totalorder %s154_s25, %s1122_s30 }
  0x13   : > { %p1131_p5 = scmp.lt.s32.totalorder %s1122_s30, %s1122_s30 }
  0x14   : > { %p1113_p11 = pneg %p1317_p10 }
  0x15   : > { %p1132_p7 = por %p1131_p5, %p1130_p3 }
  0x16   : > { %p1125_p13 = pnand %p1123_p12, %p1113_p11 }
  0x18   : > { %p1126_p0 = pneg %p1125_p13 }
  0x1a   : > { %p1133_p2 = pnand %p1132_p7, %p1126_p0 }
  0x1c   : > { %1136 = shalt.err (!%p1133_p2)
}
  0x1d   : > { %s1236_s5 = smov 64   ;;  %s1237_s6 = smov 4  }
  0x1e   : > { %1019 = dma.hbm_to_vmem [thread:$0]  (!%p1317_p10), %s1517_s1, 2048, %s154_s25, [#allocation6], %s1236_s5, %s1236_s5, %s1237_s6  }
  0x1f   : > { %p26_p9 = scmp.eq.s32.totalorder %s25_s29, 0  ;;  %p35_p11 = scmp.ne.s32.totalorder %s1229_s17, %s1225_s16 }
  0x20   : > { %p36_p12 = scmp.eq.s32.totalorder %s1233_s18, 0  ;;  %p1029_p2 = scmp.lt.s32.totalorder %s1233_s18, 4 }
  0x21   : > { %s1339_s9 = scalar_select %p26_p9, %s1229_s17, %s28_s28  }
  0x22   : > { %p37_p13 = por %p36_p12, %p35_p11  ;;  %p1529_p0 = scmp.eq.s32.totalorder %s1290_s19, 3 }
  0x23   : > { %s173_s11 = sand.u32 1, %s1229_s17   ;;  %s863_s12 = sshll.u32 %s1233_s18, 11 }
  0x24   : > { %p1343_p3 = por %p1529_p0, %p35_p11  ;;  %s799_s13 = sshll.u32 %s173_s11, 7 }
  0x25   : > { %s1352_s24 = scalar_lea.hbm %s1516_s0, %s863_s12  ;;  %s177_s25 = scalar_lea.vmem [#allocation2], %s799_s13 }
  0x26   : > { %s1530_s10 = scalar_select %p1343_p3, 1, 0 }
  0x27   : > { %s185_s26 = sshll.u32 %s177_s25, 4  ;;  %p1354_p10 = pnand %p1029_p2, %p37_p13  ;;  %s1358_s26 = int_to_ptr.vmem [resolvable:$true] %s185_s26 }
  0x28   : > { %s1360_s29 = scalar_lea.sflag [#allocation3], %s173_s11  ;;  %s1137_s30 = scalar_lea.hbm %s1352_s24, 2048 }
  0x29   : > { %p1138_p5 = scmp.ne.s32.totalorder %s1352_s24, %s1137_s30  ;;  %p1139_p7 = pneg %p1354_p10 }
  0x2a   : > { %s1142_s7 = scalar_lea.hbm %s1516_s0, 8192  ;;  %p1143_p12 = scmp.lt.s32.totalorder %s1352_s24, %s1516_s0 }
  0x2b   : > { %p1140_p9 = pnand %p1139_p7, %p1138_p5  ;;  %p1144_p2 = scmp.lt.s32.totalorder %s1142_s7, %s1137_s30 }
  0x2d   : > { %p1141_p11 = pneg %p1140_p9  ;;  %p1145_p13 = por %p1144_p2, %p1143_p12 }
  0x2f   : > { %p1146_p0 = pnand %p1145_p13, %p1141_p11 }
  0x31   : > { %1149 = shalt.err (!%p1146_p0)
}
  0x32   : > { %s1150_s11 = scalar_lea.vmem %s1358_s26, 2048  ;;  %s1238_s13 = smov [#allocation2]  }
  0x33   : > { %p1151_p1 = scmp.ne.s32.totalorder %s1358_s26, %s1150_s11  ;;  %s1155_s14 = sshll.u32 %s1238_s13, 4  ;;  %s1156_s14 = int_to_ptr.vmem [resolvable:$false] %s1155_s14 }
  0x34   : > { %s1157_s20 = scalar_lea.vmem %s1156_s14, 4096  ;;  %p1158_p9 = scmp.lt.s32.totalorder %s1358_s26, %s1156_s14 }
  0x35   : > { %p1153_p6 = pnand %p1151_p1, %p1139_p7  ;;  %p1159_p3 = scmp.lt.s32.totalorder %s1157_s20, %s1150_s11 }
  0x37   : > { %p1154_p5 = pneg %p1153_p6  ;;  %p1160_p4 = por %p1159_p3, %p1158_p9 }
  0x39   : > { %p1161_p8 = pnand %p1160_p4, %p1154_p5 }
  0x3b   : > { %1164 = shalt.err (!%p1161_p8)
}
  0x3c   : > { %s1239_s25 = smov 128   ;;  %s1240_s30 = smov 8  }
  0x3d   : > { %1023 = dma.hbm_to_vmem [thread:$0]  (!%p1354_p10), %s1352_s24, 2048, %s1358_s26, %s1360_s29, %s1239_s25, %s1239_s25, %s1240_s30  }
  0x3e   : > { %p1532_p1 = scmp.ne.s32.totalorder %s1527_s23, 0 }
  0x3f   : > { %s1384_s5 = sand.u32 (!%p1532_p1), 1, %s1225_s16   ;;  %p1533_p4 = scmp.ne.s32.totalorder (!%p1532_p1), %s1525_s21, 0 }
  0x40   : > { %197 = sbr.rel (%p1532_p1) target bundleno = 353 (0x161), region = 36  ;;  %s804_s6 = sshll.u32 (!%p1532_p1), %s1384_s5, 7 }
  0x41   : > { %s200_s7 = scalar_lea.sflag (!%p1532_p1), [#allocation3], %s1384_s5  ;;  %s1388_s8 = scalar_lea.vmem (!%p1532_p1), [#allocation2], %s804_s6 }
  0x45   : > { %1208 = dma.done.wait (%p1533_p4), %s200_s7, 2048  }
  0x46   : > { %1210 = vsyncadd (%p1533_p4), %s200_s7, 4294965248  ;;  %p1534_p6 = scmp.eq.s32.totalorder %s1290_s19, 0 }
  0x48   : > { %1212 = dma.done.wait (%p1534_p6), [#allocation6], 2048   ;;  %p1535_p8 = pmov %p1534_p6 }
  0x49   : > { %v1071_v0 = vld [vmem:[#allocation5 + $0x78] sm:$0xff]   ;;  %v1073_v2 = vld [vmem:[#allocation5 + $0x70] sm:$0xff]   ;;  %v1075_v4 = vld [vmem:[#allocation5 + $0x68] sm:$0xff]   ;;  %s806_s28 = sshll.u32 %s1384_s5, 6  ;;  %s880_s12 = sshll.u32 %s1290_s19, 10 }
  0x4a   : > { %1214 = vsyncadd (%p1535_p8), [#allocation6], 4294965248  ;;  %v1072_v1 = vld [vmem:[#allocation5 + $0x38] sm:$0xff]   ;;  %928 = vmatprep.subr.bf16.mxu0 %v1071_v0  ;;  %992 = vmatprep.subr.bf16.mxu1 %v1071_v0  ;;  %v1074_v3 = vld [vmem:[#allocation5 + $0x30] sm:$0xff]   ;;  %s1435_s29 = scalar_lea.vmem [#allocation7], %s806_s28  ;;  %s1470_s20 = scalar_lea.hbm %s1520_s4, %s880_s12 }
  0x4b   : > { %929 = vmatpush3.bf16.msra.mxu0 %v1072_v1  ;;  %1000 = vmatpush3.bf16.msra.mxu1 %v1072_v1  ;;  %v1076_v5 = vld [vmem:[#allocation5 + $0x28] sm:$0xff]   ;;  %v1077_v6 = vld [vmem:[#allocation5 + $0x60] sm:$0xff]   ;;  %v1079_v8 = vld [vmem:[#allocation5 + $0x58] sm:$0xff]   ;;  %s712_s11 = sshll.u32 %s1435_s29, 4  ;;  %s699_s19 = scalar_lea.sflag [#allocation4], %s1384_s5  ;;  %s1472_s11 = int_to_ptr.vmem [resolvable:$true] %s712_s11 }
  0x4c   : > { %930 = vmatprep.subr.bf16.mxu0 %v1073_v2  ;;  %993 = vmatprep.subr.bf16.mxu1 %v1073_v2  ;;  %v1078_v7 = vld [vmem:[#allocation5 + $0x20] sm:$0xff]   ;;  %v1080_v9 = vld [vmem:[#allocation5 + $0x18] sm:$0xff]   ;;  %v1081_v10 = vld [vmem:[#allocation5 + $0x50] sm:$0xff]   ;;  %s1165_s25 = scalar_lea.vmem %s1472_s11, 1024  ;;  %p1536_p10 = scmp.ne.s32.totalorder %s1530_s10, 0 }
  0x4d   : > { %v1089_v11 = vld [vmem:[%s1388_s8 + $0x4] ss:$8 sps:$4 sm:$0xff]   ;;  %v1082_v13 = vld [vmem:[#allocation5 + $0x10] sm:$0xff]   ;;  %v1087_v18 = vld [vmem:[%s1388_s8] ss:$8 sps:$4 sm:$0xff]   ;;  %p1166_p3 = scmp.ne.s32.totalorder %s1472_s11, %s1165_s25  ;;  %s1241_s30 = smov [#allocation7]  }
  0x4e   : > { %v1092_v12 = vld [vmem:[%s1388_s8 + $0x44] ss:$8 sps:$4 sm:$0xff]   ;;  %491 = vmatprep.mubr.bf16.mxu0 %v1089_v11  ;;  %v1090_v19 = vld [vmem:[%s1388_s8 + $0x40] ss:$8 sps:$4 sm:$0xff]   ;;  %v1093_v20 = vld [vmem:[%s1388_s8 + $0x14] ss:$8 sps:$4 sm:$0xff]  }
  0x4f   : > { %931 = vmatpush3.bf16.msra.mxu0 %v1074_v3  ;;  %1001 = vmatpush3.bf16.msra.mxu1 %v1074_v3  ;;  %v1083_v14 = vld [vmem:[#allocation5 + $0x48] sm:$0xff]   ;;  %v1085_v16 = vld [vmem:[#allocation5 + $0x40] sm:$0xff]   ;;  %v1095_v21 = vld [vmem:[%s1388_s8 + $0x54] ss:$8 sps:$4 sm:$0xff]   ;;  %p1167_p7 = pnand %p1166_p3, %p1536_p10  ;;  %s1169_s6 = sshll.u32 %s1241_s30, 4  ;;  %s1170_s6 = int_to_ptr.vmem [resolvable:$false] %s1169_s6 }
  0x50   : > { %932 = vmatprep.subr.bf16.mxu0 %v1075_v4  ;;  %994 = vmatprep.subr.bf16.mxu1 %v1075_v4  ;;  %v1084_v15 = vld [vmem:[#allocation5 + $0x8] sm:$0xff]   ;;  %v1086_v17 = vld [vmem:[#allocation5] sm:$0xff]   ;;  %v1097_v22 = vld [vmem:[%s1388_s8 + $0x10] ss:$8 sps:$4 sm:$0xff]   ;;  %s1171_s7 = scalar_lea.vmem %s1170_s6, 2048  ;;  %p1172_p12 = scmp.lt.s32.totalorder %s1472_s11, %s1170_s6 }
  0x51   : > { %523 = vmatprep.mubr.bf16.mxu1 %v1092_v12  ;;  %v1098_v23 = vld [vmem:[%s1388_s8 + $0x50] ss:$8 sps:$4 sm:$0xff]   ;;  %v1099_v24 = vld [vmem:[%s1388_s8 + $0x24] ss:$8 sps:$4 sm:$0xff]   ;;  %v1103_v26 = vld [vmem:[%s1388_s8 + $0x20] ss:$8 sps:$4 sm:$0xff]   ;;  %p1168_p11 = pneg %p1167_p7  ;;  %p1173_p2 = scmp.lt.s32.totalorder %s1171_s7, %s1165_s25 }
  0x52   : > { %v1101_v25 = vld [vmem:[%s1388_s8 + $0x64] ss:$8 sps:$4 sm:$0xff]   ;;  %v1104_v27 = vld [vmem:[%s1388_s8 + $0x60] ss:$8 sps:$4 sm:$0xff]   ;;  %v1105_v28 = vld [vmem:[%s1388_s8 + $0x34] ss:$8 sps:$4 sm:$0xff]  }
  0x53   : > { %933 = vmatpush3.bf16.msra.mxu0 %v1076_v5  ;;  %1002 = vmatpush3.bf16.msra.mxu1 %v1076_v5  ;;  %v1107_v29 = vld [vmem:[%s1388_s8 + $0x74] ss:$8 sps:$4 sm:$0xff]   ;;  %v1109_v30 = vld [vmem:[%s1388_s8 + $0x30] ss:$8 sps:$4 sm:$0xff]   ;;  %v1417_v35 = vld [vmem:[%s1518_s2] ss:$0 sm:$0xff]  ;;  %p1174_p13 = por %p1173_p2, %p1172_p12 }
  0x54   : > { %934 = vmatprep.subr.bf16.mxu0 %v1077_v6  ;;  %995 = vmatprep.subr.bf16.mxu1 %v1077_v6  ;;  %v1110_v31 = vld [vmem:[%s1388_s8 + $0x70] ss:$8 sps:$4 sm:$0xff]   ;;  %v1424_v43 = vld [vmem:[%s1519_s3] ss:$0 sm:$0xff] }
  0x55   : > { %p1175_p0 = pnand %p1174_p13, %p1168_p11 }
  0x57   : > { %935 = vmatpush3.bf16.msra.mxu0 %v1078_v7  ;;  %1003 = vmatpush3.bf16.msra.mxu1 %v1078_v7 }
  0x58   : > { %936 = vmatprep.subr.bf16.mxu0 %v1079_v8  ;;  %996 = vmatprep.subr.bf16.mxu1 %v1079_v8 }
  0x5b   : > { %937 = vmatpush3.bf16.msra.mxu0 %v1080_v9  ;;  %1004 = vmatpush3.bf16.msra.mxu1 %v1080_v9 }
  0x5c   : > { %938 = vmatprep.subr.bf16.mxu0 %v1081_v10  ;;  %997 = vmatprep.subr.bf16.mxu1 %v1081_v10 }
  0x5f   : > { %939 = vmatpush3.bf16.msra.mxu0 %v1082_v13  ;;  %1005 = vmatpush3.bf16.msra.mxu1 %v1082_v13 }
  0x60   : > { %940 = vmatprep.subr.bf16.mxu0 %v1083_v14  ;;  %998 = vmatprep.subr.bf16.mxu1 %v1083_v14 }
  0x63   : > { %941 = vmatpush3.bf16.msra.mxu0 %v1084_v15  ;;  %1006 = vmatpush3.bf16.msra.mxu1 %v1084_v15 }
  0x64   : > { %942 = vmatprep.subr.bf16.mxu0 %v1085_v16  ;;  %999 = vmatprep.subr.bf16.mxu1 %v1085_v16 }
  0x67   : > { %943 = vmatpush3.bf16.msra.mxu0 %v1086_v17  ;;  %1007 = vmatpush3.bf16.msra.mxu1 %v1086_v17 }
  0x6a   : > { %492 = vmatmul.mubr.bf16.vlgmr.msra.gmra.mxu0 %v1087_v18  ;;  %524 = vmatmul.mubr.bf16.vlgmr.msra.gmra.mxu1 %v1090_v19 }
  0x6b   : > { %499 = vmatprep.mubr.bf16.mxu0 %v1093_v20  ;;  %531 = vmatprep.mubr.bf16.mxu1 %v1095_v21 }
  0x72   : > { %500 = vmatmul.mubr.bf16.gmra.mxu0 %v1097_v22  ;;  %532 = vmatmul.mubr.bf16.gmra.mxu1 %v1098_v23 }
  0x73   : > { %507 = vmatprep.mubr.bf16.mxu0 %v1099_v24  ;;  %539 = vmatprep.mubr.bf16.mxu1 %v1101_v25 }
  0x7a   : > { %508 = vmatmul.mubr.bf16.gmra.mxu0 %v1103_v26  ;;  %540 = vmatmul.mubr.bf16.gmra.mxu1 %v1104_v27 }
  0x7b   : > { %515 = vmatprep.mubr.bf16.mxu0 %v1105_v28  ;;  %547 = vmatprep.mubr.bf16.mxu1 %v1107_v29 }
  0x82   : > { %516 = vmatmul.mubr.bf16.gmra.mxu0 %v1109_v30  ;;  %548 = vmatmul.mubr.bf16.gmra.mxu1 %v1110_v31 }
 0x12a   : > { %v944_v32 = vpop.f32.mrf.mxu0  ;;  %v968_v33 = vpop.f32.mrf.mxu1 }
 0x12c   : > { %v945_v34 = vpop.f32.mrf.mxu0  ;;  %v969_v36 = vpop.f32.mrf.mxu1 }
 0x12d   : > { %v946_v37 = vadd.f32 %v945_v34, %v944_v32  ;;  %v970_v38 = vadd.f32 %v969_v36, %v968_v33 }
 0x12e   : > { %v947_v39 = vpop.f32.mrf.mxu0  ;;  %v971_v40 = vpop.f32.mrf.mxu1 }
 0x12f   : > { %v563_v41 = vmul.f32 %v946_v37, %v1417_v35  ;;  %v571_v42 = vmul.f32 %v970_v38, %v1417_v35 }
 0x130   : > { %v948_v44 = vpop.f32.mrf.mxu0  ;;  %v972_v45 = vpop.f32.mrf.mxu1 }
 0x131   : > { %v949_v46 = vadd.f32 %v948_v44, %v947_v39  ;;  %v973_v47 = vadd.f32 %v972_v45, %v971_v40  ;;  %v586_v50 = vadd.f32 %v1424_v43, %v563_v41  ;;  %v594_v51 = vadd.f32 %v1424_v43, %v571_v42 }
 0x132   : > { %v950_v48 = vpop.f32.mrf.mxu0  ;;  %v974_v49 = vpop.f32.mrf.mxu1 }
 0x133   : > { %v564_v52 = vmul.f32 %v949_v46, %v1417_v35  ;;  %v572_v53 = vmul.f32 %v973_v47, %v1417_v35  ;;  %v602_v62 = vmax.f32 %v586_v50, 0.0  ;;  %v610_v63 = vmax.f32 %v594_v51, 0.0 }
 0x134   : > { %v951_v54 = vpop.f32.mrf.mxu0  ;;  %v975_v55 = vpop.f32.mrf.mxu1 }
 0x135   : > { %v587_v56 = vadd.f32 %v1424_v43, %v564_v52  ;;  %v595_v57 = vadd.f32 %v1424_v43, %v572_v53  ;;  %v952_v58 = vadd.f32 %v951_v54, %v950_v48  ;;  %v976_v59 = vadd.f32 %v975_v55, %v974_v49 }
 0x136   : > { %v953_v60 = vpop.f32.mrf.mxu0  ;;  %v977_v61 = vpop.f32.mrf.mxu1 }
 0x137   : > { %v603_v0 = vmax.f32 %v587_v56, 0.0  ;;  %v611_v1 = vmax.f32 %v595_v57, 0.0  ;;  %v565_v2 = vmul.f32 %v952_v58, %v1417_v35  ;;  %v573_v3 = vmul.f32 %v976_v59, %v1417_v35 }
 0x138   : > { %v954_v4 = vpop.f32.mrf.mxu0  ;;  %v978_v5 = vpop.f32.mrf.mxu1 }
 0x139   : > { %v884_v6 = vpack.c.bf16 %v603_v0, %v602_v62  ;;  %v904_v7 = vpack.c.bf16 %v611_v1, %v610_v63  ;;  %v955_v8 = vadd.f32 %v954_v4, %v953_v60  ;;  %v979_v9 = vadd.f32 %v978_v5, %v977_v61 }
 0x13a   : > { %v956_v10 = vpop.f32.mrf.mxu0  ;;  %v980_v11 = vpop.f32.mrf.mxu1  ;;  %v588_v12 = vadd.f32 %v1424_v43, %v565_v2  ;;  %v596_v13 = vadd.f32 %v1424_v43, %v573_v3 }
 0x13b   : > { %885 = vst [vmem:[%s1435_s29] sm:$0xff] %v884_v6   ;;  %924 = vst [vmem:[%s1435_s29 + $0x20] sm:$0xff] %v904_v7   ;;  %v566_v14 = vmul.f32 %v955_v8, %v1417_v35  ;;  %v574_v15 = vmul.f32 %v979_v9, %v1417_v35 }
 0x13c   : > { %v957_v16 = vpop.f32.mrf.mxu0  ;;  %v981_v17 = vpop.f32.mrf.mxu1  ;;  %v604_v26 = vmax.f32 %v588_v12, 0.0  ;;  %v612_v27 = vmax.f32 %v596_v13, 0.0 }
 0x13d   : > { %v958_v18 = vadd.f32 %v957_v16, %v956_v10  ;;  %v982_v19 = vadd.f32 %v981_v17, %v980_v11  ;;  %v589_v20 = vadd.f32 %v1424_v43, %v566_v14  ;;  %v597_v21 = vadd.f32 %v1424_v43, %v574_v15 }
 0x13e   : > { %v959_v22 = vpop.f32.mrf.mxu0  ;;  %v983_v23 = vpop.f32.mrf.mxu1 }
 0x13f   : > { %v567_v24 = vmul.f32 %v958_v18, %v1417_v35  ;;  %v575_v25 = vmul.f32 %v982_v19, %v1417_v35  ;;  %v605_v28 = vmax.f32 %v589_v20, 0.0  ;;  %v613_v29 = vmax.f32 %v597_v21, 0.0 }
 0x140   : > { %v960_v30 = vpop.f32.mrf.mxu0  ;;  %v984_v31 = vpop.f32.mrf.mxu1 }
 0x141   : > { %v961_v32 = vadd.f32 %v960_v30, %v959_v22  ;;  %v985_v33 = vadd.f32 %v984_v31, %v983_v23  ;;  %v889_v34 = vpack.c.bf16 %v605_v28, %v604_v26  ;;  %v909_v36 = vpack.c.bf16 %v613_v29, %v612_v27 }
 0x142   : > { %v962_v37 = vpop.f32.mrf.mxu0  ;;  %v986_v38 = vpop.f32.mrf.mxu1  ;;  %v590_v39 = vadd.f32 %v1424_v43, %v567_v24  ;;  %v598_v40 = vadd.f32 %v1424_v43, %v575_v25 }
 0x143   : > { %v568_v41 = vmul.f32 %v961_v32, %v1417_v35  ;;  %v576_v42 = vmul.f32 %v985_v33, %v1417_v35  ;;  %921 = vst [vmem:[%s1435_s29 + $0x8] sm:$0xff] %v889_v34   ;;  %925 = vst [vmem:[%s1435_s29 + $0x28] sm:$0xff] %v909_v36  }
 0x144   : > { %v963_v44 = vpop.f32.mrf.mxu0  ;;  %v987_v45 = vpop.f32.mrf.mxu1  ;;  %v606_v52 = vmax.f32 %v590_v39, 0.0  ;;  %v614_v53 = vmax.f32 %v598_v40, 0.0 }
 0x145   : > { %v591_v46 = vadd.f32 %v1424_v43, %v568_v41  ;;  %v599_v47 = vadd.f32 %v1424_v43, %v576_v42  ;;  %v964_v48 = vadd.f32 %v963_v44, %v962_v37  ;;  %v988_v49 = vadd.f32 %v987_v45, %v986_v38 }
 0x146   : > { %v965_v50 = vpop.f32.mrf.mxu0  ;;  %v989_v51 = vpop.f32.mrf.mxu1 }
 0x147   : > { %v607_v54 = vmax.f32 %v591_v46, 0.0  ;;  %v615_v55 = vmax.f32 %v599_v47, 0.0  ;;  %v569_v56 = vmul.f32 %v964_v48, %v1417_v35  ;;  %v577_v57 = vmul.f32 %v988_v49, %v1417_v35 }
 0x148   : > { %v966_v58 = vpop.f32.mrf.mxu0  ;;  %v990_v59 = vpop.f32.mrf.mxu1 }
 0x149   : > { %v894_v60 = vpack.c.bf16 %v607_v54, %v606_v52  ;;  %v914_v61 = vpack.c.bf16 %v615_v55, %v614_v53  ;;  %v967_v62 = vadd.f32 %v966_v58, %v965_v50  ;;  %v991_v63 = vadd.f32 %v990_v59, %v989_v51 }
 0x14a   : > { %v592_v0 = vadd.f32 %v1424_v43, %v569_v56  ;;  %v600_v1 = vadd.f32 %v1424_v43, %v577_v57 }
 0x14b   : > { %922 = vst [vmem:[%s1435_s29 + $0x10] sm:$0xff] %v894_v60   ;;  %926 = vst [vmem:[%s1435_s29 + $0x30] sm:$0xff] %v914_v61   ;;  %v570_v2 = vmul.f32 %v967_v62, %v1417_v35  ;;  %v578_v3 = vmul.f32 %v991_v63, %v1417_v35 }
 0x14c   : > { %v608_v6 = vmax.f32 %v592_v0, 0.0  ;;  %v616_v7 = vmax.f32 %v600_v1, 0.0 }
 0x14d   : > { %v593_v4 = vadd.f32 %v1424_v43, %v570_v2  ;;  %v601_v5 = vadd.f32 %v1424_v43, %v578_v3 }
 0x14f   : > { %v609_v8 = vmax.f32 %v593_v4, 0.0  ;;  %v617_v9 = vmax.f32 %v601_v5, 0.0 }
 0x151   : > { %v899_v35 = vpack.c.bf16 %v609_v8, %v608_v6  ;;  %v919_v10 = vpack.c.bf16 %v617_v9, %v616_v7 }
 0x153   : > { %923 = vst [vmem:[%s1435_s29 + $0x18] sm:$0xff] %v899_v35   ;;  %927 = vst [vmem:[%s1435_s29 + $0x38] sm:$0xff] %v919_v10  }
 0x154   : > { %1178 = shalt.err (!%p1175_p0)
}
 0x155   : > { %s1179_s8 = scalar_lea.hbm %s1470_s20, 1024  ;;  %s1183_s24 = scalar_lea.hbm %s1520_s4, 4096 }
 0x156   : > { %p1180_p5 = scmp.ne.s32.totalorder %s1470_s20, %s1179_s8  ;;  %p1184_p4 = scmp.lt.s32.totalorder %s1470_s20, %s1520_s4 }
 0x157   : > { %p1185_p6 = scmp.lt.s32.totalorder %s1183_s24, %s1179_s8 }
 0x158   : > { %p1181_p9 = pnand %p1180_p5, %p1536_p10 }
 0x159   : > { %p1186_p8 = por %p1185_p6, %p1184_p4 }
 0x15a   : > { %p1182_p1 = pneg %p1181_p9 }
 0x15c   : > { %p1187_p3 = pnand %p1186_p8, %p1182_p1 }
 0x15e   : > { %1190 = shalt.err (!%p1187_p3)
}
 0x15f   : > { %s1242_s29 = smov 64   ;;  %s1243_s12 = smov 4  }
 0x160   : > { %1014 = dma.vmem_to_hbm [thread:$0]  (%p1536_p10), %s1472_s11, 1024, %s1470_s20, %s699_s19, %s1242_s29, %s1242_s29, %s1243_s12  }
 0x161 PF: > { %p1031_p7 = scmp.ge.s32.totalorder %s1233_s18, 2  ;;  %s727_s13 = sand.u32 1, %s1221_s15  }
 0x162   : > { %p1537_p11 = scmp.ne.s32.totalorder %s1526_s22, 0  ;;  %s728_s14 = scalar_lea.sflag [#allocation4], %s727_s13 }
 0x164   : > { %p1025_p12 = pnand %p1031_p7, %p1537_p11 }
 0x166   : > { %p1026_p2 = pneg %p1025_p12 }
 0x168   : > { %1216 = dma.done.wait (%p1026_p2), %s728_s14, 1024  }
 0x169   : > { %1218 = vsyncadd (%p1026_p2), %s728_s14, 4294966272  ;;  %p18_p13 = scmp.ge.s32.totalorder %s1322_s27, 6   ;;  %s1538_s15 = smov %s1225_s16 }
 0x16a   : > { %s1539_s16 = smov %s1229_s17  ;;  %s1540_s17 = smov %s1339_s9 }
 0x16b   : > { %s1541_s18 = smov %s1322_s27  ;;  %20 = sbr.rel (!%p18_p13) target bundleno = 6 (0x6), region = 85 }
 0x170   :  { %733 = vsyncpa [#allocation3], 1 }
 0x171   :  { %735 = vsyncpa [#allocation3 + $0x1], 1 }
 0x172   :  { %736 = vsyncpa [#allocation6], 1 }
 0x173   :  { %737 = vsyncpa [#allocation4], 1 }
 0x174   :  { %739 = vsyncpa [#allocation4 + $0x1], 1 }

</bundles_post_ra>
